<compile_context>
chip_gen: v7x
topology: tpu7x:2x2x1
jax: 0.10.0
libtpu: 0.0.40
codegen_flags: <defaults>
</compile_context>

<pallas_src>
import jax
import jax.numpy as jnp
from jax.experimental import pallas as pl
from jax.experimental.pallas import tpu as pltpu


# ----------------------------------------------------------------------------
# Pallas kernel
# ----------------------------------------------------------------------------

def _swish_kernel(x_ref, o_ref):
    x = x_ref[...].astype(jnp.float32)            # stable sigmoid in f32 (EUP exp)
    o_ref[...] = (x * jax.nn.sigmoid(x)).astype(o_ref.dtype)


def _round_up(n, m):
    return ((n + m - 1) // m) * m


def swish_pallas(x, *, target_block_elems=1 << 20):
    """Elementwise swish(x) = x * sigmoid(x) via a tiled, pipelined Pallas TPU kernel."""
    orig_shape = x.shape
    dtype = x.dtype
    n = x.size
    if n == 0:
        return x

    # Sublane multiple depends on dtype packing (f32: 8, bf16: 16, int8/fp8: 32).
    itemsize = jnp.dtype(dtype).itemsize
    sub_mult = 8 * max(1, 4 // itemsize)

    # Fast path: find a lane-dense width that exactly tiles the flat tensor so we
    # can skip the pad/slice HBM round-trip entirely.
    lane_cols = None
    for cand in (1024, 512, 256, 128):
        if n % cand == 0 and (n // cand) % sub_mult == 0:
            lane_cols = cand
            break

    flat = x.reshape(-1)
    if lane_cols is not None:
        rows = n // lane_cols
        padded = False
    else:
        # Ragged fallback: zero-pad (swish(0) == 0) up to a legal 2-D slab.
        lane_cols = 512
        rows = _round_up(pl.cdiv(n, lane_cols), sub_mult)
        flat = jnp.pad(flat, (0, rows * lane_cols - n))
        padded = True

    x2d = flat.reshape(rows, lane_cols)

    # ~1M-element blocks: amortize per-step overhead, stay well inside VMEM.
    block_rows = (target_block_elems // lane_cols) // sub_mult * sub_mult
    block_rows = max(sub_mult, min(block_rows, _round_up(rows, sub_mult)))
    grid = (pl.cdiv(rows, block_rows),)          # last block masked if ragged

    out = pl.pallas_call(
        _swish_kernel,
        out_shape=jax.ShapeDtypeStruct((rows, lane_cols), dtype),
        grid=grid,
        in_specs=[pl.BlockSpec((block_rows, lane_cols), lambda i: (i, 0))],
        out_specs=pl.BlockSpec((block_rows, lane_cols), lambda i: (i, 0)),
        compiler_params=pltpu.CompilerParams(
            dimension_semantics=("parallel",),    # shard blocks across v7x's 2 TCs
            vmem_limit_bytes=32 * 1024 * 1024,    # fits v7x scoped VMEM with headroom
        ),
    )(x2d)

    out_flat = out.reshape(-1)
    if padded:
        out_flat = out_flat[:n]
    return out_flat.reshape(orig_shape)


def _swish_ref(x):
    return x * jax.nn.sigmoid(x)


# ----------------------------------------------------------------------------
# Main
# ----------------------------------------------------------------------------

if __name__ == "__main__":
    key = jax.random.PRNGKey(0)
    k1, k2, k3 = jax.random.split(key, 3)

    fwd = jax.jit(swish_pallas)

    # Primary case: NCHW activations as used inside the UNet.
    x = jax.random.normal(k1, (2, 4, 16, 16), jnp.float32) * 3.0
    y = jax.block_until_ready(fwd(x))
    assert y.shape == x.shape and y.dtype == x.dtype
    assert jnp.allclose(y, _swish_ref(x), atol=1e-5, rtol=1e-5)

    # Multi-block case: exercises the tiled / pipelined grid path (grid > 1).
    x_big = jax.random.normal(k2, (8, 128, 64, 64), jnp.float32)
    y_big = jax.block_until_ready(fwd(x_big))
    assert jnp.allclose(y_big, _swish_ref(x_big), atol=1e-5, rtol=1e-5)

    # Ragged case: exercises the zero-padding / slice-back fallback path.
    x_odd = jax.random.normal(k3, (3, 5, 17, 7), jnp.float32)
    y_odd = jax.block_until_ready(fwd(x_odd))
    assert y_odd.shape == x_odd.shape
    assert jnp.allclose(y_odd, _swish_ref(x_odd), atol=1e-5, rtol=1e-5)

    # bf16 case: exercises the dtype-dependent sublane multiple.
    x_bf16 = jax.random.normal(k1, (2, 4, 16, 16), jnp.bfloat16)
    y_bf16 = jax.block_until_ready(fwd(x_bf16))
    assert y_bf16.dtype == jnp.bfloat16
    assert jnp.allclose(y_bf16.astype(jnp.float32),
                        _swish_ref(x_bf16.astype(jnp.float32)),
                        atol=2e-2, rtol=2e-2)

    assert bool(jnp.all(jnp.isfinite(y)))
    print("KERNEL_OK")
</pallas_src>

<mosaic_0001>
module attributes {stable_mosaic.version = 11 : i64} {
  func.func @_swish_kernel(%arg0: i32, %arg1: memref<8x256xf32, #tpu.memory_space<vmem>>, %arg2: memref<8x256xf32, #tpu.memory_space<vmem>>) attributes {dimension_semantics = [#tpu.dimension_semantics<parallel>], iteration_bounds = array<i64: 1>, scalar_prefetch = 0 : i64, scratch_operands = 0 : i64, tpu.core_type = #tpu.core_type<tc>, window_params = [{transform_indices = @transform_0, window_bounds = array<i64: 8, 256>}, {transform_indices = @transform_1, window_bounds = array<i64: 8, 256>}]} {
    %c0 = arith.constant 0 : index
    %c0_0 = arith.constant 0 : index
    %0 = vector.load %arg1[%c0, %c0_0] : memref<8x256xf32, #tpu.memory_space<vmem>>, vector<8x256xf32>
    %1 = arith.negf %0 : vector<8x256xf32>
    %2 = math.exp %1 : vector<8x256xf32>
    %cst = arith.constant 1.000000e+00 : f32
    %3 = vector.broadcast %cst : f32 to vector<8x256xf32>
    %4 = arith.addf %3, %2 : vector<8x256xf32>
    %5 = arith.divf %3, %4 : vector<8x256xf32>
    %6 = arith.mulf %0, %5 : vector<8x256xf32>
    %c0_1 = arith.constant 0 : index
    %c0_2 = arith.constant 0 : index
    %7 = vector.load %arg2[%c0_1, %c0_2] : memref<8x256xf32, #tpu.memory_space<vmem>>, vector<8x256xf32>
    tpu.vector_store %arg2[%c0_1, %c0_2], %6 {strides = array<i32>} : memref<8x256xf32, #tpu.memory_space<vmem>>, vector<8x256xf32>,
    return
  }
  func.func @transform_0(%arg0: i32) -> (i32, i32) {
    %c0_i32 = arith.constant 0 : i32
    %c0_i32_0 = arith.constant 0 : i32
    return %arg0, %c0_i32 : i32, i32
  }
  func.func @transform_1(%arg0: i32) -> (i32, i32) {
    %c0_i32 = arith.constant 0 : i32
    %c0_i32_0 = arith.constant 0 : i32
    return %arg0, %c0_i32 : i32, i32
  }
}

</mosaic_0001>

<bundles_post_ra>
// kernel: swish_pallas.1
= control target key start
LH: loop header
LB: loop body
LE: loop exit
PB: predicated region body
PF: predicated region fallthrough
CT: control target
= control target key end

     0   :  { %s62_s0 = inlined_call_operand.vmem [shape: f32[8,256], index: 0, kind: input, shape index: {}]   ;;  %s63_s1 = inlined_call_operand.vmem [shape: f32[8,256], index: 1, kind: output, shape index: {}]  }
   0x1   :  { %v8_v0 = vld [vmem:[%s62_s0] sm:$0xff]  ;;  %v9_v1 = vld [vmem:[%s62_s0 + $0x8] sm:$0xff] }
   0x2   :  { %v30_v2 = vmul.f32 -1.442695, %v8_v0  ;;  %v31_v3 = vmul.f32 -1.442695, %v9_v1 }
   0x4   :  { %32 = vpow2.f32 %v30_v2 }
   0x5   :  { %34 = vpow2.f32 %v31_v3 }
   0xe   :  { %v33_v4 = vpop.eup %32 }
   0xf   :  { %v35_v5 = vpop.eup %34  ;;  %v16_v6 = vadd.f32 1.0, %v33_v4 }
  0x10   :  { %v17_v7 = vadd.f32 1.0, %v35_v5 }
  0x11   :  { %36 = vrcp.f32 %v16_v6 }
  0x12   :  { %38 = vrcp.f32 %v17_v7 }
  0x1b   :  { %v37_v8 = vpop.eup %36 }
  0x1c   :  { %v39_v9 = vpop.eup %38  ;;  %v22_v10 = vmul.f32 %v37_v8, %v8_v0 }
  0x1d   :  { %v23_v11 = vmul.f32 %v39_v9, %v9_v1 }
  0x1e   :  { %24 = vst [vmem:[%s63_s1] sm:$0xff] %v22_v10 }
  0x1f   :  { %25 = vst [vmem:[%s63_s1 + $0x8] sm:$0xff] %v23_v11 }

</bundles_post_ra>
